<compile_context>
chip_gen: v6e
topology: v6e:2x2x1
jax: 0.10.0
libtpu: 0.0.40
codegen_flags: <defaults>
</compile_context>

<pallas_src>
import jax
import jax.numpy as jnp
from jax.experimental import pallas as pl
from jax.experimental.pallas import tpu as pltpu


def _round_up(n, m):
    return ((n + m - 1) // m) * m


# ---------------------------------------------------------------------------
# Kernels
# ---------------------------------------------------------------------------

def mlp_kernel_resident(x_ref, w1_ref, b1_ref, w2_ref, b2_ref, w3_ref, b3_ref, o_ref):
    # dense1 -> relu1   (dropout1 is identity in eval mode)
    h1 = jnp.dot(x_ref[...], w1_ref[...], preferred_element_type=jnp.float32) + b1_ref[...]
    h1 = jnp.maximum(h1, 0.0)
    # dense2 -> relu2   (dropout2 is identity in eval mode)
    h2 = jnp.dot(h1.astype(w2_ref.dtype), w2_ref[...],
                 preferred_element_type=jnp.float32) + b2_ref[...]
    h2 = jnp.maximum(h2, 0.0)
    # output_layer
    o_ref[...] = (jnp.dot(h2.astype(w3_ref.dtype), w3_ref[...],
                          preferred_element_type=jnp.float32)
                  + b3_ref[...]).astype(o_ref.dtype)
    # TODO(synk): training-mode dropout (p=0.2) is omitted; this is the eval-mode forward.


def mlp_kernel_hidden_tiled(x_ref, w1_ref, b1_ref, w2_ref, b2_ref, w3_ref, b3_ref,
                            o_ref, acc_ref):
    """Same math, with the hidden dim tiled on grid axis 1 (reduction, 'arbitrary')."""
    j = pl.program_id(1)

    @pl.when(j == 0)
    def _():
        acc_ref[...] = jnp.zeros_like(acc_ref)

    # layer-1 hidden slice: relu(x @ W1[:, j] + b1[j])
    h1 = jnp.dot(x_ref[...], w1_ref[...], preferred_element_type=jnp.float32) + b1_ref[...]
    h1 = jnp.maximum(h1, 0.0)
    # partial layer-2 pre-activation: += h1_j @ W2[j, :]
    acc_ref[...] += jnp.dot(h1.astype(w2_ref.dtype), w2_ref[...],
                            preferred_element_type=jnp.float32)

    @pl.when(j == pl.num_programs(1) - 1)
    def _():
        h2 = jnp.maximum(acc_ref[...] + b2_ref[...], 0.0)
        o_ref[...] = (jnp.dot(h2.astype(w3_ref.dtype), w3_ref[...],
                              preferred_element_type=jnp.float32)
                      + b3_ref[...]).astype(o_ref.dtype)


# ---------------------------------------------------------------------------
# VMEM accounting (generation-aware)
# ---------------------------------------------------------------------------

def _vmem_budget_bytes():
    """~80% of this generation's VMEM (128 MiB on v5e/v6e, 64 MiB per core on v7x)."""
    cap = None
    try:
        cap = getattr(pltpu.get_tpu_info(), "vmem_capacity_bytes", None)
    except Exception:
        cap = None
    if not cap:
        cap = 64 << 20  # conservative: assume the smallest (v7x per-core) VMEM
    return int(cap * 0.8)


def _resident_vmem_bytes(tb, fp, hp, cp):
    """Footprint of the all-weights-resident scheme (weights single-buffered)."""
    bf16, f32 = 2, 4
    weights = (fp * hp + hp * fp + fp * cp) * bf16 + (hp + fp + cp) * f32
    io = 2 * tb * fp * bf16 + 2 * tb * cp * f32                       # x / out, double-buffered
    inter = tb * (hp * (f32 + bf16) + fp * (f32 + bf16) + cp * f32)   # h1/h2 + bf16 casts + out
    return weights + io + inter


def _htile_vmem_bytes(tb, th, fp, cp):
    """Footprint of the hidden-dim-tiled scheme."""
    bf16, f32 = 2, 4
    resident = fp * cp * bf16 + (fp + cp) * f32                        # w3 / b2 / b3 (1 buffer)
    sliced = 2 * (fp * th * bf16 + th * f32 + th * fp * bf16)          # w1/b1/w2 slices (2 bufs)
    io = 2 * tb * fp * bf16 + 2 * tb * cp * f32
    acc = tb * fp * f32
    inter = tb * (th * (f32 + bf16) + fp * (f32 + bf16) + cp * f32)
    return resident + sliced + io + acc + inter


# ---------------------------------------------------------------------------
# Host wrapper
# ---------------------------------------------------------------------------

def mlp_forward(x, params, *, force_hidden_tiling=False, hidden_tile=None):
    """Eval-mode forward of the PyTorch MLP. x: [B, F] f32; weights in [in, out] layout."""
    w1, b1, w2, b2, w3, b3 = params
    B, F = x.shape
    H = w1.shape[1]          # 2 * in_features
    C = w3.shape[1]          # num_classes

    # Lane-dense padding (multiples of 128 on every feature axis).
    Fp = _round_up(F, 128)
    Hp = _round_up(H, 128)
    Cp = _round_up(C, 128)

    budget = _vmem_budget_bytes()

    # ---- batch tile: 256-512 for big batches, 16-aligned (bf16 sublanes) when small ----
    if B <= 256:
        TB = _round_up(B, 16)
    else:
        TB = min(512, _round_up(B, 128))

    # ---- pick the execution scheme ----
    use_resident = not force_hidden_tiling
    if use_resident:
        tb_floor = min(TB, 128)
        while _resident_vmem_bytes(TB, Fp, Hp, Cp) > budget and TB > tb_floor:
            TB = max(tb_floor, _round_up(TB // 2, 16))
        use_resident = _resident_vmem_bytes(TB, Fp, Hp, Cp) <= budget

    TH = None
    if not use_resident:
        # Hidden-dim tiling fallback (needed when resident weights exceed VMEM, e.g. v7x).
        if hidden_tile is not None:
            TH = _round_up(hidden_tile, 128)
        else:
            for cand in (2048, 1024, 512, 256, 128):
                th = min(cand, Hp)
                if _htile_vmem_bytes(TB, th, Fp, Cp) <= budget:
                    TH = th
                    break
            if TH is None:
                TH = 128
        while _htile_vmem_bytes(TB, TH, Fp, Cp) > budget and TB > 16:
            TB = max(16, _round_up(TB // 2, 16))
        Hp = _round_up(Hp, TH)   # pad hidden dim to a multiple of the tile (zeros = exact)

    # Split a single-step batch grid in two so both v7x TensorCores get work.
    Bp = _round_up(B, TB)
    if Bp // TB == 1 and Bp >= 32:
        TB = _round_up(Bp // 2, 16)
        Bp = _round_up(B, TB)

    est = (_resident_vmem_bytes(TB, Fp, Hp, Cp) if use_resident
           else _htile_vmem_bytes(TB, TH, Fp, Cp))
    vmem_limit = int(min(budget, max(32 << 20, int(1.25 * est) + (8 << 20))))

    # Host-side zero padding (keeps the math exact) + bf16 cast of matmul operands.
    pad2 = lambda a, r, c: jnp.pad(a, ((0, r - a.shape[0]), (0, c - a.shape[1])))
    x_p  = pad2(x,  Bp, Fp).astype(jnp.bfloat16)
    w1_p = pad2(w1, Fp, Hp).astype(jnp.bfloat16)
    w2_p = pad2(w2, Hp, Fp).astype(jnp.bfloat16)
    w3_p = pad2(w3, Fp, Cp).astype(jnp.bfloat16)
    b1_p = pad2(b1, 1, Hp).astype(jnp.float32)
    b2_p = pad2(b2, 1, Fp).astype(jnp.float32)
    b3_p = pad2(b3, 1, Cp).astype(jnp.float32)
    args = (x_p, w1_p, b1_p, w2_p, b2_p, w3_p, b3_p)
    out_shape = jax.ShapeDtypeStruct((Bp, Cp), jnp.float32)

    def call_resident(weight_buffers):
        wkw = {} if weight_buffers is None else {"pipeline_mode": pl.Buffered(weight_buffers)}

        def res(shape):
            zeros = (0,) * len(shape)
            return pl.BlockSpec(shape, lambda i: zeros, **wkw)

        return pl.pallas_call(
            mlp_kernel_resident,
            out_shape=out_shape,
            grid=(Bp // TB,),
            in_specs=[
                pl.BlockSpec((TB, Fp), lambda i: (i, 0)),   # x tile (pipelined over batch)
                res((Fp, Hp)), res((1, Hp)),                # w1 / b1 (VMEM-resident)
                res((Hp, Fp)), res((1, Fp)),                # w2 / b2
                res((Fp, Cp)), res((1, Cp)),                # w3 / b3
            ],
            out_specs=pl.BlockSpec((TB, Cp), lambda i: (i, 0)),
            compiler_params=pltpu.CompilerParams(
                dimension_semantics=("parallel",),
                vmem_limit_bytes=vmem_limit,
            ),
        )(*args)

    def call_htile(weight_buffers):
        wkw = {} if weight_buffers is None else {"pipeline_mode": pl.Buffered(weight_buffers)}

        def res(shape):
            zeros = (0,) * len(shape)
            return pl.BlockSpec(shape, lambda i, j: zeros, **wkw)

        return pl.pallas_call(
            mlp_kernel_hidden_tiled,
            out_shape=out_shape,
            grid=(Bp // TB, Hp // TH),
            in_specs=[
                pl.BlockSpec((TB, Fp), lambda i, j: (i, 0)),   # x tile (constant across j)
                pl.BlockSpec((Fp, TH), lambda i, j: (0, j)),   # w1 column slice (pipelined)
                pl.BlockSpec((1, TH),  lambda i, j: (0, j)),   # b1 slice
                pl.BlockSpec((TH, Fp), lambda i, j: (j, 0)),   # w2 row slice (pipelined)
                res((1, Fp)), res((Fp, Cp)), res((1, Cp)),     # b2 / w3 / b3 (resident)
            ],
            out_specs=pl.BlockSpec((TB, Cp), lambda i, j: (i, 0)),
            scratch_shapes=[pltpu.VMEM((TB, Fp), jnp.float32)],
            compiler_params=pltpu.CompilerParams(
                dimension_semantics=("parallel", "arbitrary"),
                vmem_limit_bytes=vmem_limit,
            ),
        )(*args)

    call = call_resident if use_resident else call_htile
    try:
        out_p = call(1)            # single-buffered resident weights
    except Exception:
        out_p = call(None)         # fallback: default pipelining (correctness unaffected)

    return out_p[:B, :C]


# ---------------------------------------------------------------------------
# Params / reference
# ---------------------------------------------------------------------------

def init_params(key, in_features, num_classes):
    """Deterministic init mimicking PyTorch nn.Linear default (U[-1/sqrt(fan_in), +])."""
    def linear(k, fan_in, fan_out):
        kw, kb = jax.random.split(k)
        bound = 1.0 / (fan_in ** 0.5)
        w = jax.random.uniform(kw, (fan_in, fan_out), jnp.float32, -bound, bound)
        b = jax.random.uniform(kb, (1, fan_out), jnp.float32, -bound, bound)
        return w, b

    k1, k2, k3 = jax.random.split(key, 3)
    w1, b1 = linear(k1, in_features, in_features * 2)
    w2, b2 = linear(k2, in_features * 2, in_features)
    w3, b3 = linear(k3, in_features, num_classes)
    return (w1, b1, w2, b2, w3, b3)


def mlp_reference(x, params):
    """Pure-JAX eval-mode forward with bf16-rounded operands + f32 accumulation."""
    w1, b1, w2, b2, w3, b3 = params
    hi = jax.lax.Precision.HIGHEST
    bf = lambda a: a.astype(jnp.bfloat16).astype(jnp.float32)
    h1 = jnp.maximum(jnp.dot(bf(x), bf(w1), precision=hi) + b1, 0.0)
    h2 = jnp.maximum(jnp.dot(bf(h1), bf(w2), precision=hi) + b2, 0.0)
    return jnp.dot(bf(h2), bf(w3), precision=hi) + b3


if __name__ == "__main__":
    key = jax.random.PRNGKey(0)

    # Primary check: small shapes, weight-resident path.
    B, in_features, num_classes = 8, 32, 8
    kx, kp = jax.random.split(key)
    x = jax.random.normal(kx, (B, in_features), jnp.float32)
    params = init_params(kp, in_features, num_classes)

    out = mlp_forward(x, params)
    jax.block_until_ready(out)
    assert out.shape == (B, num_classes)
    ref = mlp_reference(x, params)
    assert jnp.allclose(out, ref, atol=5e-3, rtol=5e-3)

    # Secondary check: exercise the hidden-dim-tiled fallback (used when resident
    # weights exceed the per-generation VMEM budget, e.g. very large F on v7x).
    B2, F2, C2 = 24, 128, 8
    kx2, kp2 = jax.random.split(jax.random.PRNGKey(1))
    x2 = jax.random.normal(kx2, (B2, F2), jnp.float32)
    params2 = init_params(kp2, F2, C2)
    out2 = mlp_forward(x2, params2, force_hidden_tiling=True, hidden_tile=128)
    jax.block_until_ready(out2)
    assert out2.shape == (B2, C2)
    ref2 = mlp_reference(x2, params2)
    assert jnp.allclose(out2, ref2, atol=5e-3, rtol=5e-3)

    print("KERNEL_OK")
</pallas_src>

<mosaic_0001>
module attributes {stable_mosaic.version = 11 : i64} {
  func.func @mlp_kernel_resident(%arg0: i32, %arg1: memref<16x128xbf16, #tpu.memory_space<vmem>>, %arg2: memref<128x128xbf16, #tpu.memory_space<vmem>>, %arg3: memref<1x128xf32, #tpu.memory_space<vmem>>, %arg4: memref<128x128xbf16, #tpu.memory_space<vmem>>, %arg5: memref<1x128xf32, #tpu.memory_space<vmem>>, %arg6: memref<128x128xbf16, #tpu.memory_space<vmem>>, %arg7: memref<1x128xf32, #tpu.memory_space<vmem>>, %arg8: memref<16x128xf32, #tpu.memory_space<vmem>>) attributes {dimension_semantics = [#tpu.dimension_semantics<parallel>], iteration_bounds = array<i64: 1>, scalar_prefetch = 0 : i64, scratch_operands = 0 : i64, tpu.core_type = #tpu.core_type<tc>, window_params = [{transform_indices = @transform_0, window_bounds = array<i64: 16, 128>}, {pipeline_mode = #tpu.pipeline_mode<synchronous>, transform_indices = @transform_1, window_bounds = array<i64: 128, 128>}, {pipeline_mode = #tpu.pipeline_mode<synchronous>, transform_indices = @transform_2, window_bounds = array<i64: 1, 128>}, {pipeline_mode = #tpu.pipeline_mode<synchronous>, transform_indices = @transform_3, window_bounds = array<i64: 128, 128>}, {pipeline_mode = #tpu.pipeline_mode<synchronous>, transform_indices = @transform_4, window_bounds = array<i64: 1, 128>}, {pipeline_mode = #tpu.pipeline_mode<synchronous>, transform_indices = @transform_5, window_bounds = array<i64: 128, 128>}, {pipeline_mode = #tpu.pipeline_mode<synchronous>, transform_indices = @transform_6, window_bounds = array<i64: 1, 128>}, {transform_indices = @transform_7, window_bounds = array<i64: 16, 128>}]} {
    %c0 = arith.constant 0 : index
    %c0_0 = arith.constant 0 : index
    %0 = vector.load %arg1[%c0, %c0_0] : memref<16x128xbf16, #tpu.memory_space<vmem>>, vector<16x128xbf16>
    %c0_1 = arith.constant 0 : index
    %c0_2 = arith.constant 0 : index
    %1 = vector.load %arg2[%c0_1, %c0_2] : memref<128x128xbf16, #tpu.memory_space<vmem>>, vector<128x128xbf16>
    %cst = arith.constant dense<0.000000e+00> : vector<16x128xf32>
    %2 = tpu.matmul %0, %1, %cst {dimension_numbers = #tpu.dot_dimension_numbers<[1], [0], [0], [1], [0, 0, 1, 1], [], []>} : vector<16x128xbf16>, vector<128x128xbf16>, vector<16x128xf32> -> vector<16x128xf32>
    %c0_3 = arith.constant 0 : index
    %c0_4 = arith.constant 0 : index
    %3 = vector.load %arg3[%c0_3, %c0_4] : memref<1x128xf32, #tpu.memory_space<vmem>>, vector<1x128xf32>
    %4 = vector.broadcast %3 : vector<1x128xf32> to vector<16x128xf32>
    %5 = arith.addf %2, %4 : vector<16x128xf32>
    %cst_5 = arith.constant 0.000000e+00 : f32
    %6 = vector.broadcast %cst_5 : f32 to vector<16x128xf32>
    %7 = arith.maximumf %5, %6 : vector<16x128xf32>
    %8 = arith.truncf %7 : vector<16x128xf32> to vector<16x128xbf16>
    %c0_6 = arith.constant 0 : index
    %c0_7 = arith.constant 0 : index
    %9 = vector.load %arg4[%c0_6, %c0_7] : memref<128x128xbf16, #tpu.memory_space<vmem>>, vector<128x128xbf16>
    %cst_8 = arith.constant dense<0.000000e+00> : vector<16x128xf32>
    %10 = tpu.matmul %8, %9, %cst_8 {dimension_numbers = #tpu.dot_dimension_numbers<[1], [0], [0], [1], [0, 0, 1, 1], [], []>} : vector<16x128xbf16>, vector<128x128xbf16>, vector<16x128xf32> -> vector<16x128xf32>
    %c0_9 = arith.constant 0 : index
    %c0_10 = arith.constant 0 : index
    %11 = vector.load %arg5[%c0_9, %c0_10] : memref<1x128xf32, #tpu.memory_space<vmem>>, vector<1x128xf32>
    %12 = vector.broadcast %11 : vector<1x128xf32> to vector<16x128xf32>
    %13 = arith.addf %10, %12 : vector<16x128xf32>
    %cst_11 = arith.constant 0.000000e+00 : f32
    %14 = vector.broadcast %cst_11 : f32 to vector<16x128xf32>
    %15 = arith.maximumf %13, %14 : vector<16x128xf32>
    %16 = arith.truncf %15 : vector<16x128xf32> to vector<16x128xbf16>
    %c0_12 = arith.constant 0 : index
    %c0_13 = arith.constant 0 : index
    %17 = vector.load %arg6[%c0_12, %c0_13] : memref<128x128xbf16, #tpu.memory_space<vmem>>, vector<128x128xbf16>
    %cst_14 = arith.constant dense<0.000000e+00> : vector<16x128xf32>
    %18 = tpu.matmul %16, %17, %cst_14 {dimension_numbers = #tpu.dot_dimension_numbers<[1], [0], [0], [1], [0, 0, 1, 1], [], []>} : vector<16x128xbf16>, vector<128x128xbf16>, vector<16x128xf32> -> vector<16x128xf32>
    %c0_15 = arith.constant 0 : index
    %c0_16 = arith.constant 0 : index
    %19 = vector.load %arg7[%c0_15, %c0_16] : memref<1x128xf32, #tpu.memory_space<vmem>>, vector<1x128xf32>
    %20 = vector.broadcast %19 : vector<1x128xf32> to vector<16x128xf32>
    %21 = arith.addf %18, %20 : vector<16x128xf32>
    %c0_17 = arith.constant 0 : index
    %c0_18 = arith.constant 0 : index
    %22 = vector.load %arg8[%c0_17, %c0_18] : memref<16x128xf32, #tpu.memory_space<vmem>>, vector<16x128xf32>
    tpu.vector_store %arg8[%c0_17, %c0_18], %21 {strides = array<i32>} : memref<16x128xf32, #tpu.memory_space<vmem>>, vector<16x128xf32>,
    return
  }
  func.func @transform_0(%arg0: i32) -> (i32, i32) {
    %c0_i32 = arith.constant 0 : i32
    %c0_i32_0 = arith.constant 0 : i32
    return %arg0, %c0_i32 : i32, i32
  }
  func.func @transform_1(%arg0: i32) -> (i32, i32) {
    %c0_i32 = arith.constant 0 : i32
    %c0_i32_0 = arith.constant 0 : i32
    %c0_i32_1 = arith.constant 0 : i32
    return %c0_i32, %c0_i32_0 : i32, i32
  }
  func.func @transform_2(%arg0: i32) -> (i32, i32) {
    %c0_i32 = arith.constant 0 : i32
    %c0_i32_0 = arith.constant 0 : i32
    %c0_i32_1 = arith.constant 0 : i32
    return %c0_i32, %c0_i32_0 : i32, i32
  }
  func.func @transform_3(%arg0: i32) -> (i32, i32) {
    %c0_i32 = arith.constant 0 : i32
    %c0_i32_0 = arith.constant 0 : i32
    %c0_i32_1 = arith.constant 0 : i32
    return %c0_i32, %c0_i32_0 : i32, i32
  }
  func.func @transform_4(%arg0: i32) -> (i32, i32) {
    %c0_i32 = arith.constant 0 : i32
    %c0_i32_0 = arith.constant 0 : i32
    %c0_i32_1 = arith.constant 0 : i32
    return %c0_i32, %c0_i32_0 : i32, i32
  }
  func.func @transform_5(%arg0: i32) -> (i32, i32) {
    %c0_i32 = arith.constant 0 : i32
    %c0_i32_0 = arith.constant 0 : i32
    %c0_i32_1 = arith.constant 0 : i32
    return %c0_i32, %c0_i32_0 : i32, i32
  }
  func.func @transform_6(%arg0: i32) -> (i32, i32) {
    %c0_i32 = arith.constant 0 : i32
    %c0_i32_0 = arith.constant 0 : i32
    %c0_i32_1 = arith.constant 0 : i32
    return %c0_i32, %c0_i32_0 : i32, i32
  }
  func.func @transform_7(%arg0: i32) -> (i32, i32) {
    %c0_i32 = arith.constant 0 : i32
    %c0_i32_0 = arith.constant 0 : i32
    return %arg0, %c0_i32 : i32, i32
  }
}

module attributes {stable_mosaic.version = 11 : i64} {
  func.func @mlp_kernel_resident(%arg0: i32, %arg1: memref<16x128xbf16, #tpu.memory_space<vmem>>, %arg2: memref<128x128xbf16, #tpu.memory_space<vmem>>, %arg3: memref<1x128xf32, #tpu.memory_space<vmem>>, %arg4: memref<128x128xbf16, #tpu.memory_space<vmem>>, %arg5: memref<1x128xf32, #tpu.memory_space<vmem>>, %arg6: memref<128x128xbf16, #tpu.memory_space<vmem>>, %arg7: memref<1x128xf32, #tpu.memory_space<vmem>>, %arg8: memref<16x128xf32, #tpu.memory_space<vmem>>) attributes {dimension_semantics = [#tpu.dimension_semantics<parallel>], iteration_bounds = array<i64: 1>, scalar_prefetch = 0 : i64, scratch_operands = 0 : i64, tpu.core_type = #tpu.core_type<tc>, window_params = [{transform_indices = @transform_0, window_bounds = array<i64: 16, 128>}, {pipeline_mode = #tpu.pipeline_mode<synchronous>, transform_indices = @transform_1, window_bounds = array<i64: 128, 128>}, {pipeline_mode = #tpu.pipeline_mode<synchronous>, transform_indices = @transform_2, window_bounds = array<i64: 1, 128>}, {pipeline_mode = #tpu.pipeline_mode<synchronous>, transform_indices = @transform_3, window_bounds = array<i64: 128, 128>}, {pipeline_mode = #tpu.pipeline_mode<synchronous>, transform_indices = @transform_4, window_bounds = array<i64: 1, 128>}, {pipeline_mode = #tpu.pipeline_mode<synchronous>, transform_indices = @transform_5, window_bounds = array<i64: 128, 128>}, {pipeline_mode = #tpu.pipeline_mode<synchronous>, transform_indices = @transform_6, window_bounds = array<i64: 1, 128>}, {transform_indices = @transform_7, window_bounds = array<i64: 16, 128>}]} {
    %c0 = arith.constant 0 : index
    %c0_0 = arith.constant 0 : index
    %0 = vector.load %arg1[%c0, %c0_0] : memref<16x128xbf16, #tpu.memory_space<vmem>>, vector<16x128xbf16>
    %c0_1 = arith.constant 0 : index
    %c0_2 = arith.constant 0 : index
    %1 = vector.load %arg2[%c0_1, %c0_2] : memref<128x128xbf16, #tpu.memory_space<vmem>>, vector<128x128xbf16>
    %cst = arith.constant dense<0.000000e+00> : vector<16x128xf32>
    %2 = tpu.matmul %0, %1, %cst {dimension_numbers = #tpu.dot_dimension_numbers<[1], [0], [0], [1], [0, 0, 1, 1], [], []>} : vector<16x128xbf16>, vector<128x128xbf16>, vector<16x128xf32> -> vector<16x128xf32>
    %c0_3 = arith.constant 0 : index
    %c0_4 = arith.constant 0 : index
    %3 = vector.load %arg3[%c0_3, %c0_4] : memref<1x128xf32, #tpu.memory_space<vmem>>, vector<1x128xf32>
    %4 = vector.broadcast %3 : vector<1x128xf32> to vector<16x128xf32>
    %5 = arith.addf %2, %4 : vector<16x128xf32>
    %cst_5 = arith.constant 0.000000e+00 : f32
    %6 = vector.broadcast %cst_5 : f32 to vector<16x128xf32>
    %7 = arith.maximumf %5, %6 : vector<16x128xf32>
    %8 = arith.truncf %7 : vector<16x128xf32> to vector<16x128xbf16>
    %c0_6 = arith.constant 0 : index
    %c0_7 = arith.constant 0 : index
    %9 = vector.load %arg4[%c0_6, %c0_7] : memref<128x128xbf16, #tpu.memory_space<vmem>>, vector<128x128xbf16>
    %cst_8 = arith.constant dense<0.000000e+00> : vector<16x128xf32>
    %10 = tpu.matmul %8, %9, %cst_8 {dimension_numbers = #tpu.dot_dimension_numbers<[1], [0], [0], [1], [0, 0, 1, 1], [], []>} : vector<16x128xbf16>, vector<128x128xbf16>, vector<16x128xf32> -> vector<16x128xf32>
    %c0_9 = arith.constant 0 : index
    %c0_10 = arith.constant 0 : index
    %11 = vector.load %arg5[%c0_9, %c0_10] : memref<1x128xf32, #tpu.memory_space<vmem>>, vector<1x128xf32>
    %12 = vector.broadcast %11 : vector<1x128xf32> to vector<16x128xf32>
    %13 = arith.addf %10, %12 : vector<16x128xf32>
    %cst_11 = arith.constant 0.000000e+00 : f32
    %14 = vector.broadcast %cst_11 : f32 to vector<16x128xf32>
    %15 = arith.maximumf %13, %14 : vector<16x128xf32>
    %16 = arith.truncf %15 : vector<16x128xf32> to vector<16x128xbf16>
    %c0_12 = arith.constant 0 : index
    %c0_13 = arith.constant 0 : index
    %17 = vector.load %arg6[%c0_12, %c0_13] : memref<128x128xbf16, #tpu.memory_space<vmem>>, vector<128x128xbf16>
    %cst_14 = arith.constant dense<0.000000e+00> : vector<16x128xf32>
    %18 = tpu.matmul %16, %17, %cst_14 {dimension_numbers = #tpu.dot_dimension_numbers<[1], [0], [0], [1], [0, 0, 1, 1], [], []>} : vector<16x128xbf16>, vector<128x128xbf16>, vector<16x128xf32> -> vector<16x128xf32>
    %c0_15 = arith.constant 0 : index
    %c0_16 = arith.constant 0 : index
    %19 = vector.load %arg7[%c0_15, %c0_16] : memref<1x128xf32, #tpu.memory_space<vmem>>, vector<1x128xf32>
    %20 = vector.broadcast %19 : vector<1x128xf32> to vector<16x128xf32>
    %21 = arith.addf %18, %20 : vector<16x128xf32>
    %c0_17 = arith.constant 0 : index
    %c0_18 = arith.constant 0 : index
    %22 = vector.load %arg8[%c0_17, %c0_18] : memref<16x128xf32, #tpu.memory_space<vmem>>, vector<16x128xf32>
    tpu.vector_store %arg8[%c0_17, %c0_18], %21 {strides = array<i32>} : memref<16x128xf32, #tpu.memory_space<vmem>>, vector<16x128xf32>,
    return
  }
  func.func @transform_0(%arg0: i32) -> (i32, i32) {
    %c0_i32 = arith.constant 0 : i32
    %c0_i32_0 = arith.constant 0 : i32
    return %arg0, %c0_i32 : i32, i32
  }
  func.func @transform_1(%arg0: i32) -> (i32, i32) {
    %c0_i32 = arith.constant 0 : i32
    %c0_i32_0 = arith.constant 0 : i32
    %c0_i32_1 = arith.constant 0 : i32
    return %c0_i32, %c0_i32_0 : i32, i32
  }
  func.func @transform_2(%arg0: i32) -> (i32, i32) {
    %c0_i32 = arith.constant 0 : i32
    %c0_i32_0 = arith.constant 0 : i32
    %c0_i32_1 = arith.constant 0 : i32
    return %c0_i32, %c0_i32_0 : i32, i32
  }
  func.func @transform_3(%arg0: i32) -> (i32, i32) {
    %c0_i32 = arith.constant 0 : i32
    %c0_i32_0 = arith.constant 0 : i32
    %c0_i32_1 = arith.constant 0 : i32
    return %c0_i32, %c0_i32_0 : i32, i32
  }
  func.func @transform_4(%arg0: i32) -> (i32, i32) {
    %c0_i32 = arith.constant 0 : i32
    %c0_i32_0 = arith.constant 0 : i32
    %c0_i32_1 = arith.constant 0 : i32
    return %c0_i32, %c0_i32_0 : i32, i32
  }
  func.func @transform_5(%arg0: i32) -> (i32, i32) {
    %c0_i32 = arith.constant 0 : i32
    %c0_i32_0 = arith.constant 0 : i32
    %c0_i32_1 = arith.constant 0 : i32
    return %c0_i32, %c0_i32_0 : i32, i32
  }
  func.func @transform_6(%arg0: i32) -> (i32, i32) {
    %c0_i32 = arith.constant 0 : i32
    %c0_i32_0 = arith.constant 0 : i32
    %c0_i32_1 = arith.constant 0 : i32
    return %c0_i32, %c0_i32_0 : i32, i32
  }
  func.func @transform_7(%arg0: i32) -> (i32, i32) {
    %c0_i32 = arith.constant 0 : i32
    %c0_i32_0 = arith.constant 0 : i32
    return %arg0, %c0_i32 : i32, i32
  }
}

</mosaic_0001>

<bundles_post_ra>
// kernel: tpu_custom_call.1
= control target key start
LH: loop header
LB: loop body
LE: loop exit
PB: predicated region body
PF: predicated region fallthrough
CT: control target
= control target key end

     0   :  { %12 = vsyncpa [#allocation3], 0  ;;  %s830_s0 = inlined_call_operand.hbm [shape: bf16[16,128], index: 0, kind: input, shape index: {}]   ;;  %s831_s1 = inlined_call_operand.hbm [shape: bf16[128,128], index: 1, kind: input, shape index: {}]   ;;  %s832_s2 = inlined_call_operand.vmem [shape: f32[1,128], index: 2, kind: input, shape index: {}]   ;;  %s833_s3 = inlined_call_operand.hbm [shape: bf16[128,128], index: 3, kind: input, shape index: {}]   ;;  %s834_s4 = inlined_call_operand.vmem [shape: f32[1,128], index: 4, kind: input, shape index: {}]   ;;  %s835_s5 = inlined_call_operand.hbm [shape: bf16[128,128], index: 5, kind: input, shape index: {}]   ;;  %s836_s6 = inlined_call_operand.vmem [shape: f32[1,128], index: 6, kind: input, shape index: {}]   ;;  %s837_s7 = inlined_call_operand.hbm [shape: f32[16,128], index: 7, kind: output, shape index: {}]  }
   0x1   :  { %13 = vsyncpa [#allocation6], 0 }
   0x2   :  { %14 = vsyncpa [#allocation9], 0 }
   0x3   :  { %15 = vsyncpa [#allocation4], 0  ;;  %s713_s24 = smov [#allocation5]   ;;  %s714_s26 = smov [#allocation2]  }
   0x4   :  { %s33_s25 = sshll.u32 %s713_s24, 4  ;;  %s21_s27 = sshll.u32 %s714_s26, 4  ;;  %s34_s25 = int_to_ptr.vmem [resolvable:$true] %s33_s25  ;;  %s22_s27 = int_to_ptr.vmem [resolvable:$true] %s21_s27 }
   0x5   :  { %s613_s28 = scalar_lea.vmem %s34_s25, 1024  ;;  %p618_p1 = scmp.lt.s32.totalorder %s34_s25, %s34_s25 }
   0x6   :  { %p614_p0 = scmp.ne.s32.totalorder %s34_s25, %s613_s28  ;;  %p619_p2 = scmp.lt.s32.totalorder %s613_s28, %s613_s28 }
   0x8   :  { %p620_p3 = por %p619_p2, %p618_p1 }
   0xa   :  { %p621_p4 = pnand %p620_p3, %p614_p0 }
   0xc   :  { %624 = shalt.err (!%p621_p4)
}
   0xd   :  { %s715_s29 = smov 64   ;;  %s716_s30 = smov 4  }
   0xe   :  { %39 = dma.hbm_to_vmem [thread:$0]  %s831_s1, 1024, %s34_s25, [#allocation6], %s715_s29, %s715_s29, %s716_s30  }
   0xf   :  { %s633_s10 = scalar_lea.vmem %s22_s27, 128  ;;  %p638_p6 = scmp.lt.s32.totalorder %s22_s27, %s22_s27 }
  0x10   :  { %p634_p5 = scmp.ne.s32.totalorder %s22_s27, %s633_s10  ;;  %p639_p7 = scmp.lt.s32.totalorder %s633_s10, %s633_s10 }
  0x12   :  { %p640_p8 = por %p639_p7, %p638_p6 }
  0x14   :  { %p641_p9 = pnand %p640_p8, %p634_p5 }
  0x16   :  { %644 = shalt.err (!%p641_p9)
}
  0x17   :  { %27 = dma.hbm_to_vmem [thread:$0]  %s830_s0, 128, %s22_s27, [#allocation3], %s715_s29, %s715_s29, %s716_s30  }
  0x18   :  { %s717_s13 = smov [#allocation7]   ;;  %s718_s15 = smov [#allocation8]  }
  0x19   :  { %s47_s14 = sshll.u32 %s717_s13, 4  ;;  %s61_s16 = sshll.u32 %s718_s15, 4  ;;  %s48_s14 = int_to_ptr.vmem [resolvable:$true] %s47_s14  ;;  %s62_s16 = int_to_ptr.vmem [resolvable:$true] %s61_s16 }
  0x1a   :  { %s653_s1 = scalar_lea.vmem %s48_s14, 1024  ;;  %p658_p11 = scmp.lt.s32.totalorder %s48_s14, %s48_s14 }
  0x1b   :  { %p654_p10 = scmp.ne.s32.totalorder %s48_s14, %s653_s1  ;;  %p659_p12 = scmp.lt.s32.totalorder %s653_s1, %s653_s1 }
  0x1d   :  { %p660_p13 = por %p659_p12, %p658_p11 }
  0x1f   :  { %p661_p0 = pnand %p660_p13, %p654_p10 }
  0x21   :  { %664 = shalt.err (!%p661_p0)
}
  0x22   :  { %53 = dma.hbm_to_vmem [thread:$0]  %s833_s3, 1024, %s48_s14, [#allocation6], %s715_s29, %s715_s29, %s716_s30  }
  0x23   :  { %s673_s0 = scalar_lea.vmem %s62_s16, 1024  ;;  %p678_p2 = scmp.lt.s32.totalorder %s62_s16, %s62_s16 }
  0x24   :  { %p674_p1 = scmp.ne.s32.totalorder %s62_s16, %s673_s0  ;;  %p679_p3 = scmp.lt.s32.totalorder %s673_s0, %s673_s0 }
  0x26   :  { %p680_p4 = por %p679_p3, %p678_p2 }
  0x28   :  { %p681_p5 = pnand %p680_p4, %p674_p1 }
  0x2a   :  { %684 = shalt.err (!%p681_p5)
}
  0x2b   :  { %67 = dma.hbm_to_vmem [thread:$0]  %s835_s5, 1024, %s62_s16, [#allocation9], %s715_s29, %s715_s29, %s716_s30  }
  0x2c   :  { %705 = dma.done.wait [#allocation3], 128  }
  0x2d   :  { %706 = vsyncadd [#allocation3], 4294967168 }
  0x2e   :  { %707 = dma.done.wait [#allocation6], 2048  }
  0x2f   :  { %708 = vsyncadd [#allocation6], 4294965248 }
  0x30   :  { %709 = dma.done.wait [#allocation9], 1024  }
  0x31   :  { %710 = vsyncadd [#allocation9], 4294966272  ;;  %v719_v0 = vmov 0.0   ;;  %vm720_vm0 = vmmov 0   ;;  %v580_v1 = vld [vmem:[#allocation5 + $0x38] sm:$0xff]   ;;  %v581_v2 = vld [vmem:[#allocation5 + $0x30] sm:$0xff]  }
  0x32   :  { %509 = vmatprep.subr.bf16.mxu0 %v719_v0  ;;  %525 = vmatprep.mubr.msk.bf16.mxu0 %vm720_vm0, %v719_v0  ;;  %v582_v3 = vld [vmem:[#allocation5 + $0x28] sm:$0xff]   ;;  %v589_v4 = vld [vmem:[#allocation7 + $0x38] sm:$0xff]   ;;  %v583_v5 = vld [vmem:[#allocation5 + $0x20] sm:$0xff]   ;;  %s721_s24 = smov [#allocation10]  }
  0x33   :  { %529 = vmatprep.subr.bf16.mxu1 %v719_v0  ;;  %545 = vmatprep.mubr.msk.bf16.mxu1 %vm720_vm0, %v719_v0  ;;  %v590_v6 = vld [vmem:[#allocation7 + $0x30] sm:$0xff]   ;;  %v584_v7 = vld [vmem:[#allocation5 + $0x18] sm:$0xff]   ;;  %v591_v8 = vld [vmem:[#allocation7 + $0x28] sm:$0xff]   ;;  %s440_s25 = sshll.u32 %s721_s24, 4  ;;  %s441_s25 = int_to_ptr.vmem [resolvable:$true] %s440_s25 }
  0x34   :  { %510 = vmatpush3.bf16.msra.mxu0 %v580_v1  ;;  %530 = vmatpush3.bf16.msra.mxu1 %v589_v4  ;;  %v585_v9 = vld [vmem:[#allocation5 + $0x10] sm:$0xff]   ;;  %v592_v10 = vld [vmem:[#allocation7 + $0x20] sm:$0xff]   ;;  %v586_v11 = vld [vmem:[#allocation5 + $0x8] sm:$0xff]   ;;  %p690_p7 = scmp.lt.s32.totalorder %s441_s25, %s441_s25 }
  0x35   :  { %511 = vmatprep.subr.bf16.mxu0 %v719_v0  ;;  %531 = vmatprep.subr.bf16.mxu1 %v719_v0  ;;  %v593_v12 = vld [vmem:[#allocation7 + $0x18] sm:$0xff]   ;;  %v587_v13 = vld [vmem:[#allocation5] sm:$0xff]   ;;  %v594_v15 = vld [vmem:[#allocation7 + $0x10] sm:$0xff]  }
  0x36   :  { %v588_v14 = vld [vmem:[#allocation2] sm:$0xff]   ;;  %v595_v16 = vld [vmem:[#allocation7 + $0x8] sm:$0xff]   ;;  %v596_v17 = vld [vmem:[#allocation7] sm:$0xff]  }
  0x37   :  { %v597_v18 = vld [vmem:[#allocation8 + $0x38] sm:$0xff]   ;;  %v598_v19 = vld [vmem:[#allocation8 + $0x30] sm:$0xff]   ;;  %v599_v20 = vld [vmem:[#allocation8 + $0x28] sm:$0xff]  }
  0x38   :  { %512 = vmatpush3.bf16.msra.mxu0 %v581_v2  ;;  %532 = vmatpush3.bf16.msra.mxu1 %v590_v6  ;;  %v600_v21 = vld [vmem:[#allocation8 + $0x20] sm:$0xff]   ;;  %v601_v22 = vld [vmem:[#allocation8 + $0x18] sm:$0xff]   ;;  %v602_v33 = vld [vmem:[#allocation8 + $0x10] sm:$0xff]  }
  0x39   :  { %513 = vmatprep.subr.bf16.mxu0 %v719_v0  ;;  %533 = vmatprep.subr.bf16.mxu1 %v719_v0  ;;  %v454_v23 = vld [vmem:[%s832_s2] ss:$0 sm:$0xff]  ;;  %v603_v34 = vld [vmem:[#allocation8 + $0x8] sm:$0xff]   ;;  %v604_v35 = vld [vmem:[#allocation8] sm:$0xff]  }
  0x3a   :  { %v464_v36 = vld [vmem:[%s834_s4] ss:$0 sm:$0xff]  ;;  %s685_s4 = scalar_lea.vmem %s441_s25, 256 }
  0x3b   :  { %v473_v46 = vld [vmem:[%s836_s6] ss:$0 sm:$0xff]  ;;  %p686_p6 = scmp.ne.s32.totalorder %s441_s25, %s685_s4  ;;  %p691_p8 = scmp.lt.s32.totalorder %s685_s4, %s685_s4 }
  0x3c   :  { %514 = vmatpush3.bf16.msra.mxu0 %v582_v3  ;;  %534 = vmatpush3.bf16.msra.mxu1 %v591_v8 }
  0x3d   :  { %515 = vmatprep.subr.bf16.mxu0 %v719_v0  ;;  %535 = vmatprep.subr.bf16.mxu1 %v719_v0  ;;  %p692_p9 = por %p691_p8, %p690_p7 }
  0x3f   :  { %p693_p10 = pnand %p692_p9, %p686_p6 }
  0x40   :  { %516 = vmatpush3.bf16.msra.mxu0 %v583_v5  ;;  %536 = vmatpush3.bf16.msra.mxu1 %v592_v10 }
  0x41   :  { %517 = vmatprep.subr.bf16.mxu0 %v719_v0  ;;  %537 = vmatprep.subr.bf16.mxu1 %v719_v0 }
  0x44   :  { %518 = vmatpush3.bf16.msra.mxu0 %v584_v7  ;;  %538 = vmatpush3.bf16.msra.mxu1 %v593_v12 }
  0x45   :  { %519 = vmatprep.subr.bf16.mxu0 %v719_v0  ;;  %539 = vmatprep.subr.bf16.mxu1 %v719_v0 }
  0x48   :  { %520 = vmatpush3.bf16.msra.mxu0 %v585_v9  ;;  %540 = vmatpush3.bf16.msra.mxu1 %v594_v15 }
  0x49   :  { %521 = vmatprep.subr.bf16.mxu0 %v719_v0  ;;  %541 = vmatprep.subr.bf16.mxu1 %v719_v0 }
  0x4c   :  { %522 = vmatpush3.bf16.msra.mxu0 %v586_v11  ;;  %542 = vmatpush3.bf16.msra.mxu1 %v595_v16 }
  0x4d   :  { %523 = vmatprep.subr.bf16.mxu0 %v719_v0  ;;  %543 = vmatprep.subr.bf16.mxu1 %v719_v0 }
  0x50   :  { %524 = vmatpush3.bf16.msra.mxu0 %v587_v13  ;;  %544 = vmatpush3.bf16.msra.mxu1 %v596_v17 }
  0x51   :  { %549 = vmatprep.subr.bf16.mxu0 %v719_v0 }
  0x53   :  { %526 = vmatmul.mubr.bf16.vlgmr.msra.gmra.mxu0 %v588_v14 }
  0x54   :  { %565 = vmatprep.mubr.msk.bf16.mxu0 %vm720_vm0, %v719_v0  ;;  %550 = vmatpush3.bf16.msra.mxu0 %v597_v18 }
  0x55   :  { %551 = vmatprep.subr.bf16.mxu0 %v719_v0 }
  0x58   :  { %552 = vmatpush3.bf16.msra.mxu0 %v598_v19 }
  0x59   :  { %553 = vmatprep.subr.bf16.mxu0 %v719_v0 }
  0x5c   :  { %554 = vmatpush3.bf16.msra.mxu0 %v599_v20 }
  0x5d   :  { %555 = vmatprep.subr.bf16.mxu0 %v719_v0 }
  0x60   :  { %556 = vmatpush3.bf16.msra.mxu0 %v600_v21 }
  0x61   :  { %557 = vmatprep.subr.bf16.mxu0 %v719_v0 }
  0x64   :  { %558 = vmatpush3.bf16.msra.mxu0 %v601_v22 }
  0x65   :  { %559 = vmatprep.subr.bf16.mxu0 %v719_v0 }
  0x68   :  { %560 = vmatpush3.bf16.msra.mxu0 %v602_v33 }
  0x69   :  { %561 = vmatprep.subr.bf16.mxu0 %v719_v0 }
  0x6c   :  { %562 = vmatpush3.bf16.msra.mxu0 %v603_v34 }
  0x6d   :  { %563 = vmatprep.subr.bf16.mxu0 %v719_v0 }
  0x70   :  { %564 = vmatpush3.bf16.msra.mxu0 %v604_v35 }
 0x113   :  { %v196_v24 = vpop.f32.mrf.mxu0 }
 0x114   :  { %v197_v26 = vadd.f32 %v454_v23, %v196_v24 }
 0x115   :  { %v527_v25 = vpop.f32.mrf.mxu0 }
 0x116   :  { %v203_v30 = vmax.f32 %v197_v26, 0.0 }
 0x117   :  { %v199_v27 = vpop.f32.mrf.mxu0 }
 0x118   :  { %v200_v28 = vadd.f32 %v454_v23, %v199_v27 }
 0x119   :  { %v528_v29 = vpop.f32.mrf.mxu0 }
 0x11a   :  { %v204_v31 = vmax.f32 %v200_v28, 0.0 }
 0x11c   :  { %v205_v32 = vpack.c.bf16 %v204_v31, %v203_v30 }
 0x11e   :  { %546 = vmatmul.mubr.bf16.vlgmr.msra.gmra.mxu1 %v205_v32 }
 0x1de   :  { %v311_v37 = vpop.f32.mrf.mxu1 }
 0x1df   :  { %v312_v39 = vadd.f32 %v464_v36, %v311_v37 }
 0x1e0   :  { %v547_v38 = vpop.f32.mrf.mxu1 }
 0x1e1   :  { %v318_v43 = vmax.f32 %v312_v39, 0.0 }
 0x1e2   :  { %v314_v40 = vpop.f32.mrf.mxu1 }
 0x1e3   :  { %v315_v41 = vadd.f32 %v464_v36, %v314_v40 }
 0x1e4   :  { %v548_v42 = vpop.f32.mrf.mxu1 }
 0x1e5   :  { %v319_v44 = vmax.f32 %v315_v41, 0.0 }
 0x1e7   :  { %v320_v45 = vpack.c.bf16 %v319_v44, %v318_v43 }
 0x1e9   :  { %566 = vmatmul.mubr.bf16.vlgmr.msra.gmra.mxu0 %v320_v45 }
 0x2a9   :  { %v426_v47 = vpop.f32.mrf.mxu0 }
 0x2aa   :  { %v427_v48 = vadd.f32 %v473_v46, %v426_v47 }
 0x2ab   :  { %v567_v49 = vpop.f32.mrf.mxu0 }
 0x2ac   :  { %433 = vst [vmem:[#allocation10] sm:$0xff] %v427_v48 }
 0x2ad   :  { %v429_v50 = vpop.f32.mrf.mxu0 }
 0x2ae   :  { %v430_v51 = vadd.f32 %v473_v46, %v429_v50 }
 0x2af   :  { %v568_v52 = vpop.f32.mrf.mxu0 }
 0x2b0   :  { %434 = vst [vmem:[#allocation10 + $0x8] sm:$0xff] %v430_v51 }
 0x2b1   :  { %696 = shalt.err (!%p693_p10)
}
 0x2b2   :  { %s722_s26 = smov 128   ;;  %s723_s6 = smov 8  }
 0x2b3   :  { %446 = dma.vmem_to_hbm [thread:$0]  %s441_s25, 256, %s837_s7, [#allocation4], %s722_s26, %s722_s26, %s723_s6  }
 0x2b4   :  { %711 = dma.done.wait [#allocation4], 256  }
 0x2b5   :  { %712 = vsyncadd [#allocation4], 4294967040 }
 0x2b6   :  { %450 = vsyncpa [#allocation3], 1 }
 0x2b7   :  { %451 = vsyncpa [#allocation6], 1 }
 0x2b8   :  { %452 = vsyncpa [#allocation9], 1 }
 0x2b9   :  { %453 = vsyncpa [#allocation4], 1 }

// kernel: tpu_custom_call.1
= control target key start
LH: loop header
LB: loop body
LE: loop exit
PB: predicated region body
PF: predicated region fallthrough
CT: control target
= control target key end

     0   :  { %12 = vsyncpa [#allocation3], 0  ;;  %s830_s0 = inlined_call_operand.hbm [shape: bf16[16,128], index: 0, kind: input, shape index: {}]   ;;  %s831_s1 = inlined_call_operand.hbm [shape: bf16[128,128], index: 1, kind: input, shape index: {}]   ;;  %s832_s2 = inlined_call_operand.vmem [shape: f32[1,128], index: 2, kind: input, shape index: {}]   ;;  %s833_s3 = inlined_call_operand.hbm [shape: bf16[128,128], index: 3, kind: input, shape index: {}]   ;;  %s834_s4 = inlined_call_operand.vmem [shape: f32[1,128], index: 4, kind: input, shape index: {}]   ;;  %s835_s5 = inlined_call_operand.hbm [shape: bf16[128,128], index: 5, kind: input, shape index: {}]   ;;  %s836_s6 = inlined_call_operand.vmem [shape: f32[1,128], index: 6, kind: input, shape index: {}]   ;;  %s837_s7 = inlined_call_operand.hbm [shape: f32[16,128], index: 7, kind: output, shape index: {}]  }
   0x1   :  { %13 = vsyncpa [#allocation6], 0 }
   0x2   :  { %14 = vsyncpa [#allocation9], 0 }
   0x3   :  { %15 = vsyncpa [#allocation4], 0  ;;  %s713_s24 = smov [#allocation5]   ;;  %s714_s26 = smov [#allocation2]  }
   0x4   :  { %s33_s25 = sshll.u32 %s713_s24, 4  ;;  %s21_s27 = sshll.u32 %s714_s26, 4  ;;  %s34_s25 = int_to_ptr.vmem [resolvable:$true] %s33_s25  ;;  %s22_s27 = int_to_ptr.vmem [resolvable:$true] %s21_s27 }
   0x5   :  { %s613_s28 = scalar_lea.vmem %s34_s25, 1024  ;;  %p618_p1 = scmp.lt.s32.totalorder %s34_s25, %s34_s25 }
   0x6   :  { %p614_p0 = scmp.ne.s32.totalorder %s34_s25, %s613_s28  ;;  %p619_p2 = scmp.lt.s32.totalorder %s613_s28, %s613_s28 }
   0x8   :  { %p620_p3 = por %p619_p2, %p618_p1 }
   0xa   :  { %p621_p4 = pnand %p620_p3, %p614_p0 }
   0xc   :  { %624 = shalt.err (!%p621_p4)
}
   0xd   :  { %s715_s29 = smov 64   ;;  %s716_s30 = smov 4  }
   0xe   :  { %39 = dma.hbm_to_vmem [thread:$0]  %s831_s1, 1024, %s34_s25, [#allocation6], %s715_s29, %s715_s29, %s716_s30  }
   0xf   :  { %s633_s10 = scalar_lea.vmem %s22_s27, 128  ;;  %p638_p6 = scmp.lt.s32.totalorder %s22_s27, %s22_s27 }
  0x10   :  { %p634_p5 = scmp.ne.s32.totalorder %s22_s27, %s633_s10  ;;  %p639_p7 = scmp.lt.s32.totalorder %s633_s10, %s633_s10 }
  0x12   :  { %p640_p8 = por %p639_p7, %p638_p6 }
  0x14   :  { %p641_p9 = pnand %p640_p8, %p634_p5 }
  0x16   :  { %644 = shalt.err (!%p641_p9)
}
  0x17   :  { %27 = dma.hbm_to_vmem [thread:$0]  %s830_s0, 128, %s22_s27, [#allocation3], %s715_s29, %s715_s29, %s716_s30  }
  0x18   :  { %s717_s13 = smov [#allocation7]   ;;  %s718_s15 = smov [#allocation8]  }
  0x19   :  { %s47_s14 = sshll.u32 %s717_s13, 4  ;;  %s61_s16 = sshll.u32 %s718_s15, 4  ;;  %s48_s14 = int_to_ptr.vmem [resolvable:$true] %s47_s14  ;;  %s62_s16 = int_to_ptr.vmem [resolvable:$true] %s61_s16 }
  0x1a   :  { %s653_s1 = scalar_lea.vmem %s48_s14, 1024  ;;  %p658_p11 = scmp.lt.s32.totalorder %s48_s14, %s48_s14 }
  0x1b   :  { %p654_p10 = scmp.ne.s32.totalorder %s48_s14, %s653_s1  ;;  %p659_p12 = scmp.lt.s32.totalorder %s653_s1, %s653_s1 }
  0x1d   :  { %p660_p13 = por %p659_p12, %p658_p11 }
  0x1f   :  { %p661_p0 = pnand %p660_p13, %p654_p10 }
  0x21   :  { %664 = shalt.err (!%p661_p0)
}
  0x22   :  { %53 = dma.hbm_to_vmem [thread:$0]  %s833_s3, 1024, %s48_s14, [#allocation6], %s715_s29, %s715_s29, %s716_s30  }
  0x23   :  { %s673_s0 = scalar_lea.vmem %s62_s16, 1024  ;;  %p678_p2 = scmp.lt.s32.totalorder %s62_s16, %s62_s16 }
  0x24   :  { %p674_p1 = scmp.ne.s32.totalorder %s62_s16, %s673_s0  ;;  %p679_p3 = scmp.lt.s32.totalorder %s673_s0, %s673_s0 }
  0x26   :  { %p680_p4 = por %p679_p3, %p678_p2 }
  0x28   :  { %p681_p5 = pnand %p680_p4, %p674_p1 }
  0x2a   :  { %684 = shalt.err (!%p681_p5)
}
  0x2b   :  { %67 = dma.hbm_to_vmem [thread:$0]  %s835_s5, 1024, %s62_s16, [#allocation9], %s715_s29, %s715_s29, %s716_s30  }
  0x2c   :  { %705 = dma.done.wait [#allocation3], 128  }
  0x2d   :  { %706 = vsyncadd [#allocation3], 4294967168 }
  0x2e   :  { %707 = dma.done.wait [#allocation6], 2048  }
  0x2f   :  { %708 = vsyncadd [#allocation6], 4294965248 }
  0x30   :  { %709 = dma.done.wait [#allocation9], 1024  }
  0x31   :  { %710 = vsyncadd [#allocation9], 4294966272  ;;  %v719_v0 = vmov 0.0   ;;  %vm720_vm0 = vmmov 0   ;;  %v580_v1 = vld [vmem:[#allocation5 + $0x38] sm:$0xff]   ;;  %v581_v2 = vld [vmem:[#allocation5 + $0x30] sm:$0xff]  }
  0x32   :  { %509 = vmatprep.subr.bf16.mxu0 %v719_v0  ;;  %525 = vmatprep.mubr.msk.bf16.mxu0 %vm720_vm0, %v719_v0  ;;  %v582_v3 = vld [vmem:[#allocation5 + $0x28] sm:$0xff]   ;;  %v589_v4 = vld [vmem:[#allocation7 + $0x38] sm:$0xff]   ;;  %v583_v5 = vld [vmem:[#allocation5 + $0x20] sm:$0xff]   ;;  %s721_s24 = smov [#allocation10]  }
  0x33   :  { %529 = vmatprep.subr.bf16.mxu1 %v719_v0  ;;  %545 = vmatprep.mubr.msk.bf16.mxu1 %vm720_vm0, %v719_v0  ;;  %v590_v6 = vld [vmem:[#allocation7 + $0x30] sm:$0xff]   ;;  %v584_v7 = vld [vmem:[#allocation5 + $0x18] sm:$0xff]   ;;  %v591_v8 = vld [vmem:[#allocation7 + $0x28] sm:$0xff]   ;;  %s440_s25 = sshll.u32 %s721_s24, 4  ;;  %s441_s25 = int_to_ptr.vmem [resolvable:$true] %s440_s25 }
  0x34   :  { %510 = vmatpush3.bf16.msra.mxu0 %v580_v1  ;;  %530 = vmatpush3.bf16.msra.mxu1 %v589_v4  ;;  %v585_v9 = vld [vmem:[#allocation5 + $0x10] sm:$0xff]   ;;  %v592_v10 = vld [vmem:[#allocation7 + $0x20] sm:$0xff]   ;;  %v586_v11 = vld [vmem:[#allocation5 + $0x8] sm:$0xff]   ;;  %p690_p7 = scmp.lt.s32.totalorder %s441_s25, %s441_s25 }
  0x35   :  { %511 = vmatprep.subr.bf16.mxu0 %v719_v0  ;;  %531 = vmatprep.subr.bf16.mxu1 %v719_v0  ;;  %v593_v12 = vld [vmem:[#allocation7 + $0x18] sm:$0xff]   ;;  %v587_v13 = vld [vmem:[#allocation5] sm:$0xff]   ;;  %v594_v15 = vld [vmem:[#allocation7 + $0x10] sm:$0xff]  }
  0x36   :  { %v588_v14 = vld [vmem:[#allocation2] sm:$0xff]   ;;  %v595_v16 = vld [vmem:[#allocation7 + $0x8] sm:$0xff]   ;;  %v596_v17 = vld [vmem:[#allocation7] sm:$0xff]  }
  0x37   :  { %v597_v18 = vld [vmem:[#allocation8 + $0x38] sm:$0xff]   ;;  %v598_v19 = vld [vmem:[#allocation8 + $0x30] sm:$0xff]   ;;  %v599_v20 = vld [vmem:[#allocation8 + $0x28] sm:$0xff]  }
  0x38   :  { %512 = vmatpush3.bf16.msra.mxu0 %v581_v2  ;;  %532 = vmatpush3.bf16.msra.mxu1 %v590_v6  ;;  %v600_v21 = vld [vmem:[#allocation8 + $0x20] sm:$0xff]   ;;  %v601_v22 = vld [vmem:[#allocation8 + $0x18] sm:$0xff]   ;;  %v602_v33 = vld [vmem:[#allocation8 + $0x10] sm:$0xff]  }
  0x39   :  { %513 = vmatprep.subr.bf16.mxu0 %v719_v0  ;;  %533 = vmatprep.subr.bf16.mxu1 %v719_v0  ;;  %v454_v23 = vld [vmem:[%s832_s2] ss:$0 sm:$0xff]  ;;  %v603_v34 = vld [vmem:[#allocation8 + $0x8] sm:$0xff]   ;;  %v604_v35 = vld [vmem:[#allocation8] sm:$0xff]  }
  0x3a   :  { %v464_v36 = vld [vmem:[%s834_s4] ss:$0 sm:$0xff]  ;;  %s685_s4 = scalar_lea.vmem %s441_s25, 256 }
  0x3b   :  { %v473_v46 = vld [vmem:[%s836_s6] ss:$0 sm:$0xff]  ;;  %p686_p6 = scmp.ne.s32.totalorder %s441_s25, %s685_s4  ;;  %p691_p8 = scmp.lt.s32.totalorder %s685_s4, %s685_s4 }
  0x3c   :  { %514 = vmatpush3.bf16.msra.mxu0 %v582_v3  ;;  %534 = vmatpush3.bf16.msra.mxu1 %v591_v8 }
  0x3d   :  { %515 = vmatprep.subr.bf16.mxu0 %v719_v0  ;;  %535 = vmatprep.subr.bf16.mxu1 %v719_v0  ;;  %p692_p9 = por %p691_p8, %p690_p7 }
  0x3f   :  { %p693_p10 = pnand %p692_p9, %p686_p6 }
  0x40   :  { %516 = vmatpush3.bf16.msra.mxu0 %v583_v5  ;;  %536 = vmatpush3.bf16.msra.mxu1 %v592_v10 }
  0x41   :  { %517 = vmatprep.subr.bf16.mxu0 %v719_v0  ;;  %537 = vmatprep.subr.bf16.mxu1 %v719_v0 }
  0x44   :  { %518 = vmatpush3.bf16.msra.mxu0 %v584_v7  ;;  %538 = vmatpush3.bf16.msra.mxu1 %v593_v12 }
  0x45   :  { %519 = vmatprep.subr.bf16.mxu0 %v719_v0  ;;  %539 = vmatprep.subr.bf16.mxu1 %v719_v0 }
  0x48   :  { %520 = vmatpush3.bf16.msra.mxu0 %v585_v9  ;;  %540 = vmatpush3.bf16.msra.mxu1 %v594_v15 }
  0x49   :  { %521 = vmatprep.subr.bf16.mxu0 %v719_v0  ;;  %541 = vmatprep.subr.bf16.mxu1 %v719_v0 }
  0x4c   :  { %522 = vmatpush3.bf16.msra.mxu0 %v586_v11  ;;  %542 = vmatpush3.bf16.msra.mxu1 %v595_v16 }
  0x4d   :  { %523 = vmatprep.subr.bf16.mxu0 %v719_v0  ;;  %543 = vmatprep.subr.bf16.mxu1 %v719_v0 }
  0x50   :  { %524 = vmatpush3.bf16.msra.mxu0 %v587_v13  ;;  %544 = vmatpush3.bf16.msra.mxu1 %v596_v17 }
  0x51   :  { %549 = vmatprep.subr.bf16.mxu0 %v719_v0 }
  0x53   :  { %526 = vmatmul.mubr.bf16.vlgmr.msra.gmra.mxu0 %v588_v14 }
  0x54   :  { %565 = vmatprep.mubr.msk.bf16.mxu0 %vm720_vm0, %v719_v0  ;;  %550 = vmatpush3.bf16.msra.mxu0 %v597_v18 }
  0x55   :  { %551 = vmatprep.subr.bf16.mxu0 %v719_v0 }
  0x58   :  { %552 = vmatpush3.bf16.msra.mxu0 %v598_v19 }
  0x59   :  { %553 = vmatprep.subr.bf16.mxu0 %v719_v0 }
  0x5c   :  { %554 = vmatpush3.bf16.msra.mxu0 %v599_v20 }
  0x5d   :  { %555 = vmatprep.subr.bf16.mxu0 %v719_v0 }
  0x60   :  { %556 = vmatpush3.bf16.msra.mxu0 %v600_v21 }
  0x61   :  { %557 = vmatprep.subr.bf16.mxu0 %v719_v0 }
  0x64   :  { %558 = vmatpush3.bf16.msra.mxu0 %v601_v22 }
  0x65   :  { %559 = vmatprep.subr.bf16.mxu0 %v719_v0 }
  0x68   :  { %560 = vmatpush3.bf16.msra.mxu0 %v602_v33 }
  0x69   :  { %561 = vmatprep.subr.bf16.mxu0 %v719_v0 }
  0x6c   :  { %562 = vmatpush3.bf16.msra.mxu0 %v603_v34 }
  0x6d   :  { %563 = vmatprep.subr.bf16.mxu0 %v719_v0 }
  0x70   :  { %564 = vmatpush3.bf16.msra.mxu0 %v604_v35 }
 0x113   :  { %v196_v24 = vpop.f32.mrf.mxu0 }
 0x114   :  { %v197_v26 = vadd.f32 %v454_v23, %v196_v24 }
 0x115   :  { %v527_v25 = vpop.f32.mrf.mxu0 }
 0x116   :  { %v203_v30 = vmax.f32 %v197_v26, 0.0 }
 0x117   :  { %v199_v27 = vpop.f32.mrf.mxu0 }
 0x118   :  { %v200_v28 = vadd.f32 %v454_v23, %v199_v27 }
 0x119   :  { %v528_v29 = vpop.f32.mrf.mxu0 }
 0x11a   :  { %v204_v31 = vmax.f32 %v200_v28, 0.0 }
 0x11c   :  { %v205_v32 = vpack.c.bf16 %v204_v31, %v203_v30 }
 0x11e   :  { %546 = vmatmul.mubr.bf16.vlgmr.msra.gmra.mxu1 %v205_v32 }
 0x1de   :  { %v311_v37 = vpop.f32.mrf.mxu1 }
 0x1df   :  { %v312_v39 = vadd.f32 %v464_v36, %v311_v37 }
 0x1e0   :  { %v547_v38 = vpop.f32.mrf.mxu1 }
 0x1e1   :  { %v318_v43 = vmax.f32 %v312_v39, 0.0 }
 0x1e2   :  { %v314_v40 = vpop.f32.mrf.mxu1 }
 0x1e3   :  { %v315_v41 = vadd.f32 %v464_v36, %v314_v40 }
 0x1e4   :  { %v548_v42 = vpop.f32.mrf.mxu1 }
 0x1e5   :  { %v319_v44 = vmax.f32 %v315_v41, 0.0 }
 0x1e7   :  { %v320_v45 = vpack.c.bf16 %v319_v44, %v318_v43 }
 0x1e9   :  { %566 = vmatmul.mubr.bf16.vlgmr.msra.gmra.mxu0 %v320_v45 }
 0x2a9   :  { %v426_v47 = vpop.f32.mrf.mxu0 }
 0x2aa   :  { %v427_v48 = vadd.f32 %v473_v46, %v426_v47 }
 0x2ab   :  { %v567_v49 = vpop.f32.mrf.mxu0 }
 0x2ac   :  { %433 = vst [vmem:[#allocation10] sm:$0xff] %v427_v48 }
 0x2ad   :  { %v429_v50 = vpop.f32.mrf.mxu0 }
 0x2ae   :  { %v430_v51 = vadd.f32 %v473_v46, %v429_v50 }
 0x2af   :  { %v568_v52 = vpop.f32.mrf.mxu0 }
 0x2b0   :  { %434 = vst [vmem:[#allocation10 + $0x8] sm:$0xff] %v430_v51 }
 0x2b1   :  { %696 = shalt.err (!%p693_p10)
}
 0x2b2   :  { %s722_s26 = smov 128   ;;  %s723_s6 = smov 8  }
 0x2b3   :  { %446 = dma.vmem_to_hbm [thread:$0]  %s441_s25, 256, %s837_s7, [#allocation4], %s722_s26, %s722_s26, %s723_s6  }
 0x2b4   :  { %711 = dma.done.wait [#allocation4], 256  }
 0x2b5   :  { %712 = vsyncadd [#allocation4], 4294967040 }
 0x2b6   :  { %450 = vsyncpa [#allocation3], 1 }
 0x2b7   :  { %451 = vsyncpa [#allocation6], 1 }
 0x2b8   :  { %452 = vsyncpa [#allocation9], 1 }
 0x2b9   :  { %453 = vsyncpa [#allocation4], 1 }

</bundles_post_ra>
